<compile_context>
chip_gen: v6e
topology: v6e:2x2x1
jax: 0.10.0
libtpu: 0.0.40
codegen_flags: <defaults>
</compile_context>

<pallas_src>
import functools

import jax
import jax.numpy as jnp
from jax.experimental import pallas as pl
from jax.experimental.pallas import tpu as pltpu


def _round_up(x, m):
    return (x + m - 1) // m * m


def _cdiv(a, b):
    return (a + b - 1) // b


def _vmem_capacity_bytes():
    try:
        return int(pltpu.get_tpu_info().vmem_capacity_bytes)
    except Exception:
        return 64 << 20  # conservative fallback: v7x per-TensorCore VMEM


@functools.lru_cache(maxsize=None)
def _single_buffer_supported():
    # Probe whether this jax version accepts pipeline_mode=pl.Buffered(1).
    try:
        pl.BlockSpec((8, 128), lambda i: (0, 0), pipeline_mode=pl.Buffered(1))
        return True
    except Exception:
        return False


def _choose_k_tile(hp, max_weight_bytes, w_is):
    """Largest tk (multiple of 128, dividing hp) whose double-buffered
    W1/W2 blocks (4 * tk * hp * itemsize) fit in max_weight_bytes."""
    for n_k in range(1, hp // 128 + 1):
        if hp % n_k:
            continue
        tk = hp // n_k
        if tk % 128:
            continue
        if 4 * tk * hp * w_is <= max_weight_bytes:
            return tk
    return 128


# --------------------------- kernel bodies ---------------------------------


def _ffn_kernel(x_ref, w1_ref, b1_ref, w2_ref, b2_ref, o_ref):
    # Full weights resident in VMEM (single-buffered, constant index).
    x = x_ref[...]  # native dtype -> full-rate MXU, f32 accumulation below
    h = jnp.dot(x, w1_ref[...], preferred_element_type=jnp.float32)
    h = jnp.maximum(h + b1_ref[...].astype(jnp.float32), 0.0)  # dropout1 = identity
    y = jnp.dot(h.astype(w2_ref.dtype), w2_ref[...],
                preferred_element_type=jnp.float32)
    # dropout2 = identity; residual add
    y = y + b2_ref[...].astype(jnp.float32) + x.astype(jnp.float32)
    o_ref[...] = y.astype(o_ref.dtype)


def _ffn_kernel_ktiled(x_ref, w1_ref, b1_ref, w2_ref, b2_ref, o_ref, acc_ref):
    # Grid = (row tiles, intermediate-dim tiles).  The FFN intermediate axis
    # is elementwise through the ReLU, so summing per-k partial products
    # relu(x @ W1[:, k] + b1[k]) @ W2[k, :] is exact.
    k = pl.program_id(1)

    @pl.when(k == 0)
    def _init():
        acc_ref[...] = jnp.zeros_like(acc_ref)

    x = x_ref[...]
    h = jnp.dot(x, w1_ref[...], preferred_element_type=jnp.float32)
    h = jnp.maximum(h + b1_ref[...].astype(jnp.float32), 0.0)  # dropout1 = identity
    acc_ref[...] += jnp.dot(h.astype(w2_ref.dtype), w2_ref[...],
                            preferred_element_type=jnp.float32)

    @pl.when(k == pl.num_programs(1) - 1)
    def _finalize():
        y = acc_ref[...] + b2_ref[...].astype(jnp.float32) + x.astype(jnp.float32)
        o_ref[...] = y.astype(o_ref.dtype)


# ------------------------------ wrapper -------------------------------------


def pointwise_feedforward(x, w1, b1, w2, b2, *, row_tile=None, k_tile=None,
                          bf16_matmul=False):
    """x: (B, T, H). w1, w2: Conv1d(k=1) weights squeezed to (H_out, H_in).
    b1, b2: (H,). Returns (B, T, H) = x + conv2(relu(conv1(x))) (eval mode)."""
    orig_dtype = x.dtype
    B, T, H = x.shape
    rows = B * T

    if bf16_matmul:
        # Optional: halve HBM bytes / full-rate MXU; accumulation stays f32.
        x = x.astype(jnp.bfloat16)
        w1 = w1.astype(jnp.bfloat16)
        w2 = w2.astype(jnp.bfloat16)

    x_is = jnp.dtype(x.dtype).itemsize
    w_is = jnp.dtype(w1.dtype).itemsize
    sub = {4: 8, 2: 16, 1: 32}.get(x_is, 8)  # sublane multiple for the dtype

    Hp = _round_up(H, 128)  # lane-dense hidden dim

    # --- operand prep (Conv1d(k=1) == x @ W.T + b in channels-last rows) ---
    x2 = x.reshape(rows, H)
    if Hp != H:
        x2 = jnp.pad(x2, ((0, 0), (0, Hp - H)))  # zero-width when H % 128 == 0

    def prep_w(w):
        wt = w.T
        if Hp != H:
            wt = jnp.pad(wt, ((0, Hp - H), (0, Hp - H)))
        return wt

    def prep_b(b):
        if Hp != H:
            b = jnp.pad(b, (0, Hp - H))
        return b.reshape(1, Hp)

    w1t, w2t = prep_w(w1), prep_w(w2)
    b1r, b2r = prep_b(b1), prep_b(b2)

    # --- VMEM budget & tile sizing ------------------------------------------
    cap = _vmem_capacity_bytes()
    budget = cap * 3 // 4  # leave compiler headroom (matters most on v7x 64 MiB)

    wbuf = 1 if _single_buffer_supported() else 2
    full_w_bytes = wbuf * 2 * Hp * Hp * w_is

    use_ktile = (k_tile is not None and k_tile < Hp) or (full_w_bytes > budget // 2)

    if use_ktile:
        if k_tile is not None:
            tk = int(k_tile)
            if Hp % tk or tk % 128:
                raise ValueError("k_tile must be a multiple of 128 dividing the "
                                 "padded hidden dim")
        else:
            tk = _choose_k_tile(Hp, budget // 3, w_is)
        # W1/W2 k-blocks are double-buffered (index varies with k); biases tiny.
        fixed = 4 * tk * Hp * w_is + 2 * 8 * (tk + Hp) * w_is
        per_row = Hp * (4 * x_is + 8) + 4 * tk  # x/out dbl-buf + acc/h f32 internals
    else:
        tk = Hp
        fixed = full_w_bytes + wbuf * 2 * 8 * Hp * w_is
        per_row = Hp * (4 * x_is + 8)  # x/out dbl-buf + f32 h/y internals

    avail = max(budget - fixed, per_row * sub)
    rt_cap = max((avail // per_row) // sub * sub, sub)
    desired = int(row_tile) if row_tile is not None else 1024
    rt = min(_round_up(desired, sub), _round_up(rows, sub), rt_cap)
    rt = max(rt, sub)
    # Guarantee >= 2 row steps when rows allow (v7x megacore + pipelining).
    if _cdiv(rows, rt) < 2 and rows >= 2 * sub:
        rt = max(sub, _round_up(_cdiv(rows, 2), sub))
    grid_rows = _cdiv(rows, rt)  # ragged last block handled by Pallas (masked store)

    footprint = fixed + rt * per_row
    vmem_limit = int(min(max(footprint + (8 << 20), 32 << 20), cap * 17 // 20))

    # --- specs ----------------------------------------------------------------
    if not use_ktile:
        if wbuf == 1:
            def mk_const(shape):
                return pl.BlockSpec(shape, lambda i: (0, 0),
                                    pipeline_mode=pl.Buffered(1))
        else:
            def mk_const(shape):
                return pl.BlockSpec(shape, lambda i: (0, 0))
        in_specs = [
            pl.BlockSpec((rt, Hp), lambda i: (i, 0)),
            mk_const((Hp, Hp)),
            mk_const((1, Hp)),
            mk_const((Hp, Hp)),
            mk_const((1, Hp)),
        ]
        out_specs = pl.BlockSpec((rt, Hp), lambda i: (i, 0))
        grid = (grid_rows,)
        scratch = []
        dims = ("parallel",)
        kernel = _ffn_kernel
    else:
        in_specs = [
            pl.BlockSpec((rt, Hp), lambda i, k: (i, 0)),   # fetched once per i
            pl.BlockSpec((Hp, tk), lambda i, k: (0, k)),
            pl.BlockSpec((1, tk), lambda i, k: (0, k)),
            pl.BlockSpec((tk, Hp), lambda i, k: (k, 0)),
            pl.BlockSpec((1, Hp), lambda i, k: (0, 0)),
        ]
        out_specs = pl.BlockSpec((rt, Hp), lambda i, k: (i, 0))
        grid = (grid_rows, Hp // tk)
        scratch = [pltpu.VMEM((rt, Hp), jnp.float32)]
        dims = ("parallel", "arbitrary")
        kernel = _ffn_kernel_ktiled

    out = pl.pallas_call(
        kernel,
        out_shape=jax.ShapeDtypeStruct((rows, Hp), orig_dtype),
        grid_spec=pltpu.PrefetchScalarGridSpec(
            num_scalar_prefetch=0,
            grid=grid,
            in_specs=in_specs,
            out_specs=out_specs,
            scratch_shapes=scratch,
        ),
        compiler_params=pltpu.CompilerParams(
            dimension_semantics=dims,
            vmem_limit_bytes=vmem_limit,
        ),
    )(x2, w1t, b1r, w2t, b2r)

    if Hp != H:
        out = out[:, :H]
    return out.reshape(B, T, H)


def _reference(x, w1, b1, w2, b2):
    # Pure-JAX reference of the PyTorch forward (eval mode).
    h = jnp.maximum(jnp.einsum("bth,oh->bto", x, w1) + b1, 0.0)
    y = jnp.einsum("bth,oh->bto", h, w2) + b2
    return y + x


if __name__ == "__main__":
    key = jax.random.PRNGKey(0)
    (kx, kw1, kb1, kw2, kb2,
     kx2, kw3, kb3, kw4, kb4) = jax.random.split(key, 10)

    # --- small test (hidden_units = 32), exercises the fully-resident path ---
    B, T, H = 2, 8, 32
    scale = 1.0 / jnp.sqrt(H)
    x = jax.random.normal(kx, (B, T, H), dtype=jnp.float32)
    # Conv1d(H, H, kernel_size=1) weights: (H_out, H_in, 1) -> squeeze last dim.
    w1 = jax.random.uniform(kw1, (H, H), jnp.float32, -scale, scale)
    b1 = jax.random.uniform(kb1, (H,), jnp.float32, -scale, scale)
    w2 = jax.random.uniform(kw2, (H, H), jnp.float32, -scale, scale)
    b2 = jax.random.uniform(kb2, (H,), jnp.float32, -scale, scale)

    ffn = jax.jit(pointwise_feedforward)
    out = jax.block_until_ready(ffn(x, w1, b1, w2, b2))
    ref = _reference(x, w1, b1, w2, b2)
    assert out.shape == (B, T, H)
    assert jnp.allclose(out, ref, atol=1e-5, rtol=1e-5), "mismatch vs reference (small)"

    # --- second test forcing the K-tiled (large-H) path -----------------------
    B2, T2, H2 = 2, 16, 256
    scale2 = 1.0 / jnp.sqrt(H2)
    x_l = jax.random.normal(kx2, (B2, T2, H2), dtype=jnp.float32)
    w1_l = jax.random.uniform(kw3, (H2, H2), jnp.float32, -scale2, scale2)
    b1_l = jax.random.uniform(kb3, (H2,), jnp.float32, -scale2, scale2)
    w2_l = jax.random.uniform(kw4, (H2, H2), jnp.float32, -scale2, scale2)
    b2_l = jax.random.uniform(kb4, (H2,), jnp.float32, -scale2, scale2)

    ffn_kt = jax.jit(functools.partial(pointwise_feedforward, row_tile=16, k_tile=128))
    out_l = jax.block_until_ready(ffn_kt(x_l, w1_l, b1_l, w2_l, b2_l))
    ref_l = _reference(x_l, w1_l, b1_l, w2_l, b2_l)
    assert out_l.shape == (B2, T2, H2)
    assert jnp.allclose(out_l, ref_l, atol=1e-4, rtol=1e-4), "mismatch vs reference (k-tiled)"

    print("KERNEL_OK")
</pallas_src>

<mosaic_0001>
module attributes {stable_mosaic.version = 11 : i64} {
  func.func @_ffn_kernel(%arg0: i32, %arg1: memref<8x128xf32, #tpu.memory_space<vmem>>, %arg2: memref<128x128xf32, #tpu.memory_space<vmem>>, %arg3: memref<1x128xf32, #tpu.memory_space<vmem>>, %arg4: memref<128x128xf32, #tpu.memory_space<vmem>>, %arg5: memref<1x128xf32, #tpu.memory_space<vmem>>, %arg6: memref<8x128xf32, #tpu.memory_space<vmem>>) attributes {dimension_semantics = [#tpu.dimension_semantics<parallel>], iteration_bounds = array<i64: 2>, scalar_prefetch = 0 : i64, scratch_operands = 0 : i64, tpu.core_type = #tpu.core_type<tc>, window_params = [{transform_indices = @transform_0, window_bounds = array<i64: 8, 128>}, {pipeline_mode = #tpu.pipeline_mode<synchronous>, transform_indices = @transform_1, window_bounds = array<i64: 128, 128>}, {pipeline_mode = #tpu.pipeline_mode<synchronous>, transform_indices = @transform_2, window_bounds = array<i64: 1, 128>}, {pipeline_mode = #tpu.pipeline_mode<synchronous>, transform_indices = @transform_3, window_bounds = array<i64: 128, 128>}, {pipeline_mode = #tpu.pipeline_mode<synchronous>, transform_indices = @transform_4, window_bounds = array<i64: 1, 128>}, {transform_indices = @transform_5, window_bounds = array<i64: 8, 128>}]} {
    %c0 = arith.constant 0 : index
    %c0_0 = arith.constant 0 : index
    %0 = vector.load %arg1[%c0, %c0_0] : memref<8x128xf32, #tpu.memory_space<vmem>>, vector<8x128xf32>
    %c0_1 = arith.constant 0 : index
    %c0_2 = arith.constant 0 : index
    %1 = vector.load %arg2[%c0_1, %c0_2] : memref<128x128xf32, #tpu.memory_space<vmem>>, vector<128x128xf32>
    %cst = arith.constant dense<0.000000e+00> : vector<8x128xf32>
    %2 = tpu.matmul %0, %1, %cst {dimension_numbers = #tpu.dot_dimension_numbers<[1], [0], [0], [1], [0, 0, 1, 1], [], []>} : vector<8x128xf32>, vector<128x128xf32>, vector<8x128xf32> -> vector<8x128xf32>
    %c0_3 = arith.constant 0 : index
    %c0_4 = arith.constant 0 : index
    %3 = vector.load %arg3[%c0_3, %c0_4] : memref<1x128xf32, #tpu.memory_space<vmem>>, vector<1x128xf32>
    %4 = vector.broadcast %3 : vector<1x128xf32> to vector<8x128xf32>
    %5 = arith.addf %2, %4 : vector<8x128xf32>
    %cst_5 = arith.constant 0.000000e+00 : f32
    %6 = vector.broadcast %cst_5 : f32 to vector<8x128xf32>
    %7 = arith.maximumf %5, %6 : vector<8x128xf32>
    %c0_6 = arith.constant 0 : index
    %c0_7 = arith.constant 0 : index
    %8 = vector.load %arg4[%c0_6, %c0_7] : memref<128x128xf32, #tpu.memory_space<vmem>>, vector<128x128xf32>
    %cst_8 = arith.constant dense<0.000000e+00> : vector<8x128xf32>
    %9 = tpu.matmul %7, %8, %cst_8 {dimension_numbers = #tpu.dot_dimension_numbers<[1], [0], [0], [1], [0, 0, 1, 1], [], []>} : vector<8x128xf32>, vector<128x128xf32>, vector<8x128xf32> -> vector<8x128xf32>
    %c0_9 = arith.constant 0 : index
    %c0_10 = arith.constant 0 : index
    %10 = vector.load %arg5[%c0_9, %c0_10] : memref<1x128xf32, #tpu.memory_space<vmem>>, vector<1x128xf32>
    %11 = vector.broadcast %10 : vector<1x128xf32> to vector<8x128xf32>
    %12 = arith.addf %9, %11 : vector<8x128xf32>
    %13 = arith.addf %12, %0 : vector<8x128xf32>
    %c0_11 = arith.constant 0 : index
    %c0_12 = arith.constant 0 : index
    %14 = vector.load %arg6[%c0_11, %c0_12] : memref<8x128xf32, #tpu.memory_space<vmem>>, vector<8x128xf32>
    tpu.vector_store %arg6[%c0_11, %c0_12], %13 {strides = array<i32>} : memref<8x128xf32, #tpu.memory_space<vmem>>, vector<8x128xf32>,
    return
  }
  func.func @transform_0(%arg0: i32) -> (i32, i32) {
    %c0_i32 = arith.constant 0 : i32
    %c0_i32_0 = arith.constant 0 : i32
    return %arg0, %c0_i32 : i32, i32
  }
  func.func @transform_1(%arg0: i32) -> (i32, i32) {
    %c0_i32 = arith.constant 0 : i32
    %c0_i32_0 = arith.constant 0 : i32
    %c0_i32_1 = arith.constant 0 : i32
    return %c0_i32, %c0_i32_0 : i32, i32
  }
  func.func @transform_2(%arg0: i32) -> (i32, i32) {
    %c0_i32 = arith.constant 0 : i32
    %c0_i32_0 = arith.constant 0 : i32
    %c0_i32_1 = arith.constant 0 : i32
    return %c0_i32, %c0_i32_0 : i32, i32
  }
  func.func @transform_3(%arg0: i32) -> (i32, i32) {
    %c0_i32 = arith.constant 0 : i32
    %c0_i32_0 = arith.constant 0 : i32
    %c0_i32_1 = arith.constant 0 : i32
    return %c0_i32, %c0_i32_0 : i32, i32
  }
  func.func @transform_4(%arg0: i32) -> (i32, i32) {
    %c0_i32 = arith.constant 0 : i32
    %c0_i32_0 = arith.constant 0 : i32
    %c0_i32_1 = arith.constant 0 : i32
    return %c0_i32, %c0_i32_0 : i32, i32
  }
  func.func @transform_5(%arg0: i32) -> (i32, i32) {
    %c0_i32 = arith.constant 0 : i32
    %c0_i32_0 = arith.constant 0 : i32
    return %arg0, %c0_i32 : i32, i32
  }
}

</mosaic_0001>

<bundles_post_ra>
// kernel: pointwise_feedforward.1
= control target key start
LH: loop header
LB: loop body
LE: loop exit
PB: predicated region body
PF: predicated region fallthrough
CT: control target
= control target key end

     0   :  { %s628_s18 = smov 0   ;;  %s792_s0 = inlined_call_operand.vmem [shape: f32[16,128], index: 0, kind: input, shape index: {}]   ;;  %s793_s1 = inlined_call_operand.vmem [shape: f32[128,128], index: 1, kind: input, shape index: {}]   ;;  %s794_s2 = inlined_call_operand.vmem [shape: f32[1,128], index: 2, kind: input, shape index: {}]   ;;  %s795_s3 = inlined_call_operand.vmem [shape: f32[128,128], index: 3, kind: input, shape index: {}]   ;;  %s796_s4 = inlined_call_operand.vmem [shape: f32[1,128], index: 4, kind: input, shape index: {}]   ;;  %s797_s5 = inlined_call_operand.vmem [shape: f32[16,128], index: 5, kind: output, shape index: {}]  }
   0x1 LB: > { %s463_s19 = sadd.s32 4294967295, %s594_s18   ;;  %p467_p0 = scmp.ge.s32.totalorder %s594_s18, 1  ;;  %s594_s18 = sphi %s628_s18, %s15_s18  }
   0x2   : > { %p186_p1 = scmp.lt.s32.totalorder %s594_s18, 3 }
   0x4   : > { %p187_p2 = pnand %p467_p0, %p186_p1 }
   0x5   : > { %p212_p3 = scmp.lt.s32.totalorder (!%p187_p2), %s463_s19, 1 }
   0x6   : > { %190 = sbr.rel (%p187_p2) target bundleno = 439 (0x1b7), region = 40 }
   0xb   : > { %v236_v0 = vld [vmem:[%s793_s1 + $0x78] sm:$0xff]  ;;  %v596_v1 = vmov 0.0   ;;  %v235_v2 = vld [vmem:[%s793_s1 + $0x70] sm:$0xff]  ;;  %vm597_vm0 = vmmov 0   ;;  %v234_v3 = vld [vmem:[%s793_s1 + $0x68] sm:$0xff]  ;;  %s799_s19 = smov (!%p212_p3, %s463_s19), 1 }
   0xc   : > { %508 = vmatprep.subr.mxu0 %v596_v1  ;;  %540 = vmatprep.mubr.msk.f32.mxu0 %vm597_vm0, %v596_v1  ;;  %v233_v4 = vld [vmem:[%s793_s1 + $0x60] sm:$0xff]  ;;  %v330_v5 = vld [vmem:[%s795_s3 + $0x78] sm:$0xff]  ;;  %v329_v6 = vld [vmem:[%s795_s3 + $0x70] sm:$0xff]  ;;  %s468_s22 = sshll.u32 %s799_s19, 3 }
   0xd   : > { %509 = vmatpush3.msra.mxu0 %v236_v0  ;;  %543 = vmatprep.subr.mxu1 %v596_v1  ;;  %v232_v7 = vld [vmem:[%s793_s1 + $0x58] sm:$0xff]  ;;  %v328_v8 = vld [vmem:[%s795_s3 + $0x68] sm:$0xff]  ;;  %v231_v9 = vld [vmem:[%s793_s1 + $0x50] sm:$0xff]  ;;  %s215_s6 = scalar_lea.vmem %s792_s0, %s468_s22  ;;  %s219_s26 = scalar_lea.vmem %s797_s5, %s468_s22 }
   0xe   : > { %510 = vmatprep.subr.mxu0 %v596_v1  ;;  %575 = vmatprep.mubr.msk.f32.mxu1 %vm597_vm0, %v596_v1  ;;  %v327_v10 = vld [vmem:[%s795_s3 + $0x60] sm:$0xff]  ;;  %v230_v11 = vld [vmem:[%s793_s1 + $0x48] sm:$0xff]  ;;  %v326_v12 = vld [vmem:[%s795_s3 + $0x58] sm:$0xff] }
   0xf   : > { %511 = vmatpush3.msra.mxu0 %v235_v2  ;;  %544 = vmatpush3.msra.mxu1 %v330_v5  ;;  %v229_v13 = vld [vmem:[%s793_s1 + $0x40] sm:$0xff]  ;;  %v325_v14 = vld [vmem:[%s795_s3 + $0x50] sm:$0xff]  ;;  %v228_v15 = vld [vmem:[%s793_s1 + $0x38] sm:$0xff] }
  0x10   : > { %512 = vmatprep.subr.mxu0 %v596_v1  ;;  %545 = vmatprep.subr.mxu1 %v596_v1  ;;  %v324_v16 = vld [vmem:[%s795_s3 + $0x48] sm:$0xff]  ;;  %v227_v17 = vld [vmem:[%s793_s1 + $0x30] sm:$0xff]  ;;  %v323_v18 = vld [vmem:[%s795_s3 + $0x40] sm:$0xff] }
  0x11   : > { %513 = vmatpush3.msra.mxu0 %v234_v3  ;;  %546 = vmatpush3.msra.mxu1 %v329_v6  ;;  %v226_v19 = vld [vmem:[%s793_s1 + $0x28] sm:$0xff]  ;;  %v322_v20 = vld [vmem:[%s795_s3 + $0x38] sm:$0xff]  ;;  %v225_v21 = vld [vmem:[%s793_s1 + $0x20] sm:$0xff] }
  0x12   : > { %514 = vmatprep.subr.mxu0 %v596_v1  ;;  %547 = vmatprep.subr.mxu1 %v596_v1  ;;  %v321_v22 = vld [vmem:[%s795_s3 + $0x30] sm:$0xff]  ;;  %v224_v23 = vld [vmem:[%s793_s1 + $0x18] sm:$0xff]  ;;  %v320_v24 = vld [vmem:[%s795_s3 + $0x28] sm:$0xff] }
  0x13   : > { %515 = vmatpush3.msra.mxu0 %v233_v4  ;;  %548 = vmatpush3.msra.mxu1 %v328_v8  ;;  %v223_v25 = vld [vmem:[%s793_s1 + $0x10] sm:$0xff]  ;;  %v319_v26 = vld [vmem:[%s795_s3 + $0x20] sm:$0xff]  ;;  %v222_v27 = vld [vmem:[%s793_s1 + $0x8] sm:$0xff] }
  0x14   : > { %516 = vmatprep.subr.mxu0 %v596_v1  ;;  %549 = vmatprep.subr.mxu1 %v596_v1  ;;  %v318_v28 = vld [vmem:[%s795_s3 + $0x18] sm:$0xff]  ;;  %v221_v29 = vld [vmem:[%s793_s1] sm:$0xff]  ;;  %v317_v31 = vld [vmem:[%s795_s3 + $0x10] sm:$0xff] }
  0x15   : > { %517 = vmatpush3.msra.mxu0 %v232_v7  ;;  %550 = vmatpush3.msra.mxu1 %v327_v10  ;;  %v220_v30 = vld [vmem:[%s215_s6] sm:$0xff]  ;;  %v316_v32 = vld [vmem:[%s795_s3 + $0x8] sm:$0xff] }
  0x16   : > { %518 = vmatprep.subr.mxu0 %v596_v1  ;;  %551 = vmatprep.subr.mxu1 %v596_v1  ;;  %v315_v33 = vld [vmem:[%s795_s3] sm:$0xff] }
  0x17   : > { %519 = vmatpush3.msra.mxu0 %v231_v9  ;;  %552 = vmatpush3.msra.mxu1 %v326_v12  ;;  %v470_v34 = vld [vmem:[%s794_s2] ss:$0 sm:$0xff] }
  0x18   : > { %520 = vmatprep.subr.mxu0 %v596_v1  ;;  %553 = vmatprep.subr.mxu1 %v596_v1  ;;  %v471_v39 = vld [vmem:[%s796_s4] ss:$0 sm:$0xff] }
  0x19   : > { %521 = vmatpush3.msra.mxu0 %v230_v11  ;;  %554 = vmatpush3.msra.mxu1 %v325_v14 }
  0x1a   : > { %522 = vmatprep.subr.mxu0 %v596_v1  ;;  %555 = vmatprep.subr.mxu1 %v596_v1 }
  0x1b   : > { %523 = vmatpush3.msra.mxu0 %v229_v13  ;;  %556 = vmatpush3.msra.mxu1 %v324_v16 }
  0x1c   : > { %524 = vmatprep.subr.mxu0 %v596_v1  ;;  %557 = vmatprep.subr.mxu1 %v596_v1 }
  0x1d   : > { %525 = vmatpush3.msra.mxu0 %v228_v15  ;;  %558 = vmatpush3.msra.mxu1 %v323_v18 }
  0x1e   : > { %526 = vmatprep.subr.mxu0 %v596_v1  ;;  %559 = vmatprep.subr.mxu1 %v596_v1 }
  0x1f   : > { %527 = vmatpush3.msra.mxu0 %v227_v17  ;;  %560 = vmatpush3.msra.mxu1 %v322_v20 }
  0x20   : > { %528 = vmatprep.subr.mxu0 %v596_v1  ;;  %561 = vmatprep.subr.mxu1 %v596_v1 }
  0x21   : > { %529 = vmatpush3.msra.mxu0 %v226_v19  ;;  %562 = vmatpush3.msra.mxu1 %v321_v22 }
  0x22   : > { %530 = vmatprep.subr.mxu0 %v596_v1  ;;  %563 = vmatprep.subr.mxu1 %v596_v1 }
  0x23   : > { %531 = vmatpush3.msra.mxu0 %v225_v21  ;;  %564 = vmatpush3.msra.mxu1 %v320_v24 }
  0x24   : > { %532 = vmatprep.subr.mxu0 %v596_v1  ;;  %565 = vmatprep.subr.mxu1 %v596_v1 }
  0x25   : > { %533 = vmatpush3.msra.mxu0 %v224_v23  ;;  %566 = vmatpush3.msra.mxu1 %v319_v26 }
  0x26   : > { %534 = vmatprep.subr.mxu0 %v596_v1  ;;  %567 = vmatprep.subr.mxu1 %v596_v1 }
  0x27   : > { %535 = vmatpush3.msra.mxu0 %v223_v25  ;;  %568 = vmatpush3.msra.mxu1 %v318_v28 }
  0x28   : > { %536 = vmatprep.subr.mxu0 %v596_v1  ;;  %569 = vmatprep.subr.mxu1 %v596_v1 }
  0x29   : > { %537 = vmatpush3.msra.mxu0 %v222_v27  ;;  %570 = vmatpush3.msra.mxu1 %v317_v31 }
  0x2a   : > { %538 = vmatprep.subr.mxu0 %v596_v1  ;;  %571 = vmatprep.subr.mxu1 %v596_v1 }
  0x2b   : > { %539 = vmatpush3.msra.mxu0 %v221_v29  ;;  %572 = vmatpush3.msra.mxu1 %v316_v32 }
  0x2c   : > { %541 = vmatmul.mubr.f32.vlgmr.msra.gmra.mxu0 %v220_v30  ;;  %573 = vmatprep.subr.mxu1 %v596_v1 }
  0x2d   : > { %574 = vmatpush3.msra.mxu1 %v315_v33 }
  0xec   : > { %v310_v35 = vpop.f32.mrf.mxu0 }
  0xed   : > { %v311_v36 = vadd.f32 %v470_v34, %v310_v35 }
  0xee   : > { %v542_v37 = vpop.f32.mrf.mxu0 }
  0xef   : > { %v314_v38 = vmax.f32 %v311_v36, 0.0 }
  0xf1   : > { %576 = vmatmul.mubr.f32.vlgmr.msra.gmra.mxu1 %v314_v38 }
 0x1b1   : > { %v404_v40 = vpop.f32.mrf.mxu1 }
 0x1b2   : > { %v405_v41 = vadd.f32 %v471_v39, %v404_v40 }
 0x1b3   : > { %v577_v42 = vpop.f32.mrf.mxu1 }
 0x1b4   : > { %v408_v43 = vadd.f32 %v405_v41, %v220_v30 }
 0x1b6   : > { %409 = vst [vmem:[%s219_s26] sm:$0xff] %v408_v43 }
 0x1b7 PF: > { %s15_s18 = sadd.s32 1, %s594_s18  }
 0x1b8   : > { %p12_p4 = scmp.ge.s32.totalorder %s15_s18, 4  }
 0x1ba   :  { %14 = sbr.rel (!%p12_p4) target bundleno = 1 (0x1), region = 70 }

</bundles_post_ra>
